<compile_context>
chip_gen: v7x
topology: tpu7x:2x2x1
jax: 0.10.0
libtpu: 0.0.40
codegen_flags: <defaults>
</compile_context>

<pallas_src>
import functools

import jax
import jax.numpy as jnp
from jax.experimental import pallas as pl
from jax.experimental.pallas import tpu as pltpu


LANE = 128      # lane width: pad all feature dims to a multiple of this
SUBLANE = 8     # sublane width: pad batch and set dims to a multiple of this


def _round_up(x, m):
    return (x + m - 1) // m * m


def _pad_axis(a, axis, target):
    pad = target - a.shape[axis]
    if pad == 0:
        return a
    widths = [(0, 0)] * a.ndim
    widths[axis] = (0, pad)
    return jnp.pad(a, widths)


def deepset_kernel(x_ref, w1_ref, b1_ref, w2_ref, b2_ref,
                   w3_ref, b3_ref, w4_ref, b4_ref, o_ref, *,
                   n_pad, n_valid, normalize):
    # x_ref: (B_TILE * N_p, E_p) bf16, pre-flattened in the wrapper.
    rows, _ = x_ref.shape
    bt = rows // n_pad

    # --- phi: two tall Linear->ReLU layers on the MXU (bf16 ops, f32 acc) ---
    h = jnp.dot(x_ref[...], w1_ref[...], preferred_element_type=jnp.float32)
    h = jnp.maximum(h + b1_ref[...], 0.0)                       # (rows, H_p) f32
    h = jnp.dot(h.astype(jnp.bfloat16), w2_ref[...],
                preferred_element_type=jnp.float32)
    h = jnp.maximum(h + b2_ref[...], 0.0)                       # (rows, H_p) f32

    # Padded set rows are relu(b)-driven nonzeros: mask them out before summing.
    if n_pad != n_valid:
        set_idx = jax.lax.broadcasted_iota(jnp.int32, (rows, 1), 0) % n_pad
        h = jnp.where(set_idx < n_valid, h, 0.0)

    # Sum over the set dimension (dim=1 in the PyTorch module).
    # N_p is a multiple of 8, so this value reshape is a free view.
    agg = jnp.sum(h.reshape(bt, n_pad, -1), axis=1)             # (B_TILE, H_p)

    # --- rho: Linear -> ReLU -> Linear, batched over the whole tile ---
    r = jnp.dot(agg.astype(jnp.bfloat16), w3_ref[...],
                preferred_element_type=jnp.float32)
    r = jnp.maximum(r + b3_ref[...], 0.0)                       # (B_TILE, H_p)
    out = jnp.dot(r.astype(jnp.bfloat16), w4_ref[...],
                  preferred_element_type=jnp.float32) + b4_ref[...]  # (B_TILE, O_p)

    if normalize:
        # torch.nn.functional.normalize(p=2, dim=1, eps=1e-12)
        # 1/sqrt(max(ss, eps^2)) == 1/max(||x||, eps); rsqrt runs on the EUP.
        # Padded output columns are exactly 0, so the sum of squares is exact.
        sumsq = jnp.sum(out * out, axis=-1, keepdims=True)
        out = out * jax.lax.rsqrt(jnp.maximum(sumsq, 1e-24))

    o_ref[...] = out


def emb_projector_forward(x, params, normalize=False, b_tile=512):
    """x: (B, N, E) float32. Returns (B, O) float32."""
    B, N, E = x.shape
    w1, b1, w2, b2, w3, b3, w4, b4 = params
    H = w1.shape[1]
    O = w4.shape[1]

    # --- pad feature dims to lane multiples, set dim to a sublane multiple ---
    E_p = _round_up(E, LANE)
    H_p = _round_up(H, LANE)
    O_p = _round_up(O, LANE)
    N_p = _round_up(N, SUBLANE)

    # Weights -> bf16 once (MXU operands); biases stay f32 for the VPU adds.
    w1p = _pad_axis(_pad_axis(w1, 0, E_p), 1, H_p).astype(jnp.bfloat16)
    b1p = _pad_axis(b1, 1, H_p)
    w2p = _pad_axis(_pad_axis(w2, 0, H_p), 1, H_p).astype(jnp.bfloat16)
    b2p = _pad_axis(b2, 1, H_p)
    w3p = _pad_axis(_pad_axis(w3, 0, H_p), 1, H_p).astype(jnp.bfloat16)
    b3p = _pad_axis(b3, 1, H_p)
    w4p = _pad_axis(_pad_axis(w4, 0, H_p), 1, O_p).astype(jnp.bfloat16)
    b4p = _pad_axis(b4, 1, O_p)

    # --- VMEM-budgeted, balanced batch tiling ---
    weight_bytes = (2 * (E_p * H_p + 2 * H_p * H_p + H_p * O_p)   # bf16 weights (x1 buffer)
                    + 4 * (3 * H_p + O_p))                        # f32 biases   (x1 buffer)
    per_row_bytes = (2 * 2 * N_p * E_p        # bf16 x tile, double-buffered
                     + 2 * 4 * O_p            # f32 out tile, double-buffered
                     + 3 * 4 * N_p * H_p      # live f32/bf16 phi intermediates
                     + 2 * 4 * H_p)           # agg / r slabs
    VMEM_BUDGET = 48 * 1024 * 1024            # conservative for v7x's 64 MiB/TC
    cap = max((VMEM_BUDGET - weight_bytes) // per_row_bytes, SUBLANE)
    cap = max(cap // SUBLANE * SUBLANE, SUBLANE)

    num_tiles = max(-(-B // b_tile), 1)
    if B >= 2 * SUBLANE:
        num_tiles = max(num_tiles, 2)         # let megacore (v7x 2 TCs) shard the grid
    B_TILE = max(min(_round_up(-(-B // num_tiles), SUBLANE), cap), SUBLANE)
    B_p = _round_up(B, B_TILE)

    # Pre-flatten x to (B_p*N_p, E_p) bf16: lane-dense, no in-kernel relayout.
    x_p = _pad_axis(_pad_axis(_pad_axis(x, 2, E_p), 1, N_p), 0, B_p)
    x_flat = x_p.reshape(B_p * N_p, E_p).astype(jnp.bfloat16)

    grid = (B_p // B_TILE,)

    def resident(shape):
        # Constant blocks: same tile every step -> single-buffer them.
        return pl.BlockSpec(shape, lambda b: (0,) * len(shape),
                            pipeline_mode=pl.Buffered(1))

    vmem_limit = int(min(max((weight_bytes + B_TILE * per_row_bytes) * 1.25,
                             32 * 1024 * 1024),
                         64 * 1024 * 1024))

    cost = pl.CostEstimate(
        flops=int(2 * B_p * N_p * E_p * H_p + 2 * B_p * N_p * H_p * H_p
                  + 2 * B_p * H_p * H_p + 2 * B_p * H_p * O_p),
        transcendentals=int(B_p if normalize else 0),
        bytes_accessed=int(B_p * N_p * E_p * 2 + weight_bytes + B_p * O_p * 4),
    )

    out = pl.pallas_call(
        functools.partial(deepset_kernel, n_pad=N_p, n_valid=N,
                          normalize=normalize),
        out_shape=jax.ShapeDtypeStruct((B_p, O_p), jnp.float32),
        grid_spec=pltpu.PrefetchScalarGridSpec(
            num_scalar_prefetch=0,
            grid=grid,
            in_specs=[
                pl.BlockSpec((B_TILE * N_p, E_p), lambda b: (b, 0)),  # x tile
                resident((E_p, H_p)), resident((1, H_p)),             # phi layer 1
                resident((H_p, H_p)), resident((1, H_p)),             # phi layer 2
                resident((H_p, H_p)), resident((1, H_p)),             # rho layer 1
                resident((H_p, O_p)), resident((1, O_p)),             # rho layer 2
            ],
            out_specs=pl.BlockSpec((B_TILE, O_p), lambda b: (b, 0)),
        ),
        compiler_params=pltpu.CompilerParams(
            dimension_semantics=("parallel",),
            vmem_limit_bytes=vmem_limit),
        cost_estimate=cost,
    )(x_flat, w1p, b1p, w2p, b2p, w3p, b3p, w4p, b4p)

    return out[:B, :O]


def init_params(key, emb_dim, hidden_dim, output_dim):
    """Deterministic synthetic params; Linear weights stored as (in, out)."""
    ks = jax.random.split(key, 8)

    def lin(kw, kb, fan_in, fan_out):
        bound = 1.0 / jnp.sqrt(fan_in)
        w = jax.random.uniform(kw, (fan_in, fan_out), jnp.float32, -bound, bound)
        b = jax.random.uniform(kb, (1, fan_out), jnp.float32, -bound, bound)
        return w, b

    w1, b1 = lin(ks[0], ks[1], emb_dim, hidden_dim)
    w2, b2 = lin(ks[2], ks[3], hidden_dim, hidden_dim)
    w3, b3 = lin(ks[4], ks[5], hidden_dim, hidden_dim)
    w4, b4 = lin(ks[6], ks[7], hidden_dim, output_dim)
    return (w1, b1, w2, b2, w3, b3, w4, b4)


def reference_forward(x, params, normalize=False):
    w1, b1, w2, b2, w3, b3, w4, b4 = params
    h = jax.nn.relu(x @ w1 + b1)
    h = jax.nn.relu(h @ w2 + b2)
    agg = h.sum(axis=1)
    r = jax.nn.relu(agg @ w3 + b3)
    out = r @ w4 + b4
    if normalize:
        out = out / jnp.maximum(
            jnp.sqrt(jnp.sum(out * out, axis=1, keepdims=True)), 1e-12)
    return out


if __name__ == "__main__":
    key = jax.random.PRNGKey(0)

    # Test 1: the module's nominal small shape.
    B, N, E, H, O = 2, 8, 16, 32, 16
    kx, kp = jax.random.split(key)
    x = jax.random.normal(kx, (B, N, E), jnp.float32)
    params = init_params(kp, E, H, O)

    out = emb_projector_forward(x, params, normalize=False)
    out_norm = emb_projector_forward(x, params, normalize=True)
    jax.block_until_ready(out)
    jax.block_until_ready(out_norm)

    ref = reference_forward(x, params, normalize=False)
    ref_norm = reference_forward(x, params, normalize=True)
    # bf16 MXU operands (f32 accumulation) -> relaxed tolerance vs f32 reference.
    assert jnp.allclose(out, ref, atol=3e-2, rtol=3e-2)
    assert jnp.allclose(out_norm, ref_norm, atol=3e-2, rtol=3e-2)

    # Test 2: awkward batch and set sizes to exercise B padding and N masking.
    B2, N2 = 10, 5
    kx2, _ = jax.random.split(kx)
    x2 = jax.random.normal(kx2, (B2, N2, E), jnp.float32)
    out2 = emb_projector_forward(x2, params, normalize=True)
    jax.block_until_ready(out2)
    ref2 = reference_forward(x2, params, normalize=True)
    assert jnp.allclose(out2, ref2, atol=3e-2, rtol=3e-2)

    print("KERNEL_OK")
</pallas_src>

<mosaic_0001>
module attributes {stable_mosaic.version = 11 : i64} {
  func.func @deepset_kernel(%arg0: i32, %arg1: memref<64x128xbf16, #tpu.memory_space<vmem>>, %arg2: memref<128x128xbf16, #tpu.memory_space<vmem>>, %arg3: memref<1x128xf32, #tpu.memory_space<vmem>>, %arg4: memref<128x128xbf16, #tpu.memory_space<vmem>>, %arg5: memref<1x128xf32, #tpu.memory_space<vmem>>, %arg6: memref<128x128xbf16, #tpu.memory_space<vmem>>, %arg7: memref<1x128xf32, #tpu.memory_space<vmem>>, %arg8: memref<128x128xbf16, #tpu.memory_space<vmem>>, %arg9: memref<1x128xf32, #tpu.memory_space<vmem>>, %arg10: memref<8x128xf32, #tpu.memory_space<vmem>>) attributes {dimension_semantics = [#tpu.dimension_semantics<parallel>], iteration_bounds = array<i64: 1>, scalar_prefetch = 0 : i64, scratch_operands = 0 : i64, tpu.core_type = #tpu.core_type<tc>, window_params = [{transform_indices = @transform_0, window_bounds = array<i64: 64, 128>}, {pipeline_mode = #tpu.pipeline_mode<synchronous>, transform_indices = @transform_1, window_bounds = array<i64: 128, 128>}, {pipeline_mode = #tpu.pipeline_mode<synchronous>, transform_indices = @transform_2, window_bounds = array<i64: 1, 128>}, {pipeline_mode = #tpu.pipeline_mode<synchronous>, transform_indices = @transform_3, window_bounds = array<i64: 128, 128>}, {pipeline_mode = #tpu.pipeline_mode<synchronous>, transform_indices = @transform_4, window_bounds = array<i64: 1, 128>}, {pipeline_mode = #tpu.pipeline_mode<synchronous>, transform_indices = @transform_5, window_bounds = array<i64: 128, 128>}, {pipeline_mode = #tpu.pipeline_mode<synchronous>, transform_indices = @transform_6, window_bounds = array<i64: 1, 128>}, {pipeline_mode = #tpu.pipeline_mode<synchronous>, transform_indices = @transform_7, window_bounds = array<i64: 128, 128>}, {pipeline_mode = #tpu.pipeline_mode<synchronous>, transform_indices = @transform_8, window_bounds = array<i64: 1, 128>}, {transform_indices = @transform_9, window_bounds = array<i64: 8, 128>}]} {
    %c0 = arith.constant 0 : index
    %c0_0 = arith.constant 0 : index
    %0 = vector.load %arg1[%c0, %c0_0] : memref<64x128xbf16, #tpu.memory_space<vmem>>, vector<64x128xbf16>
    %c0_1 = arith.constant 0 : index
    %c0_2 = arith.constant 0 : index
    %1 = vector.load %arg2[%c0_1, %c0_2] : memref<128x128xbf16, #tpu.memory_space<vmem>>, vector<128x128xbf16>
    %cst = arith.constant dense<0.000000e+00> : vector<64x128xf32>
    %2 = tpu.matmul %0, %1, %cst {dimension_numbers = #tpu.dot_dimension_numbers<[1], [0], [0], [1], [0, 0, 1, 1], [], []>} : vector<64x128xbf16>, vector<128x128xbf16>, vector<64x128xf32> -> vector<64x128xf32>
    %c0_3 = arith.constant 0 : index
    %c0_4 = arith.constant 0 : index
    %3 = vector.load %arg3[%c0_3, %c0_4] : memref<1x128xf32, #tpu.memory_space<vmem>>, vector<1x128xf32>
    %4 = vector.broadcast %3 : vector<1x128xf32> to vector<64x128xf32>
    %5 = arith.addf %2, %4 : vector<64x128xf32>
    %cst_5 = arith.constant 0.000000e+00 : f32
    %6 = vector.broadcast %cst_5 : f32 to vector<64x128xf32>
    %7 = arith.maximumf %5, %6 : vector<64x128xf32>
    %8 = arith.truncf %7 : vector<64x128xf32> to vector<64x128xbf16>
    %c0_6 = arith.constant 0 : index
    %c0_7 = arith.constant 0 : index
    %9 = vector.load %arg4[%c0_6, %c0_7] : memref<128x128xbf16, #tpu.memory_space<vmem>>, vector<128x128xbf16>
    %cst_8 = arith.constant dense<0.000000e+00> : vector<64x128xf32>
    %10 = tpu.matmul %8, %9, %cst_8 {dimension_numbers = #tpu.dot_dimension_numbers<[1], [0], [0], [1], [0, 0, 1, 1], [], []>} : vector<64x128xbf16>, vector<128x128xbf16>, vector<64x128xf32> -> vector<64x128xf32>
    %c0_9 = arith.constant 0 : index
    %c0_10 = arith.constant 0 : index
    %11 = vector.load %arg5[%c0_9, %c0_10] : memref<1x128xf32, #tpu.memory_space<vmem>>, vector<1x128xf32>
    %12 = vector.broadcast %11 : vector<1x128xf32> to vector<64x128xf32>
    %13 = arith.addf %10, %12 : vector<64x128xf32>
    %cst_11 = arith.constant 0.000000e+00 : f32
    %14 = vector.broadcast %cst_11 : f32 to vector<64x128xf32>
    %15 = arith.maximumf %13, %14 : vector<64x128xf32>
    %16 = vector.shape_cast %15 : vector<64x128xf32> to vector<8x8x128xf32>
    %cst_12 = arith.constant dense<0.000000e+00> : vector<8x128xf32>
    %17 = vector.multi_reduction <add>, %16, %cst_12 [1] : vector<8x8x128xf32> to vector<8x128xf32>
    %18 = arith.truncf %17 : vector<8x128xf32> to vector<8x128xbf16>
    %c0_13 = arith.constant 0 : index
    %c0_14 = arith.constant 0 : index
    %19 = vector.load %arg6[%c0_13, %c0_14] : memref<128x128xbf16, #tpu.memory_space<vmem>>, vector<128x128xbf16>
    %cst_15 = arith.constant dense<0.000000e+00> : vector<8x128xf32>
    %20 = tpu.matmul %18, %19, %cst_15 {dimension_numbers = #tpu.dot_dimension_numbers<[1], [0], [0], [1], [0, 0, 1, 1], [], []>} : vector<8x128xbf16>, vector<128x128xbf16>, vector<8x128xf32> -> vector<8x128xf32>
    %c0_16 = arith.constant 0 : index
    %c0_17 = arith.constant 0 : index
    %21 = vector.load %arg7[%c0_16, %c0_17] : memref<1x128xf32, #tpu.memory_space<vmem>>, vector<1x128xf32>
    %22 = vector.broadcast %21 : vector<1x128xf32> to vector<8x128xf32>
    %23 = arith.addf %20, %22 : vector<8x128xf32>
    %cst_18 = arith.constant 0.000000e+00 : f32
    %24 = vector.broadcast %cst_18 : f32 to vector<8x128xf32>
    %25 = arith.maximumf %23, %24 : vector<8x128xf32>
    %26 = arith.truncf %25 : vector<8x128xf32> to vector<8x128xbf16>
    %c0_19 = arith.constant 0 : index
    %c0_20 = arith.constant 0 : index
    %27 = vector.load %arg8[%c0_19, %c0_20] : memref<128x128xbf16, #tpu.memory_space<vmem>>, vector<128x128xbf16>
    %cst_21 = arith.constant dense<0.000000e+00> : vector<8x128xf32>
    %28 = tpu.matmul %26, %27, %cst_21 {dimension_numbers = #tpu.dot_dimension_numbers<[1], [0], [0], [1], [0, 0, 1, 1], [], []>} : vector<8x128xbf16>, vector<128x128xbf16>, vector<8x128xf32> -> vector<8x128xf32>
    %c0_22 = arith.constant 0 : index
    %c0_23 = arith.constant 0 : index
    %29 = vector.load %arg9[%c0_22, %c0_23] : memref<1x128xf32, #tpu.memory_space<vmem>>, vector<1x128xf32>
    %30 = vector.broadcast %29 : vector<1x128xf32> to vector<8x128xf32>
    %31 = arith.addf %28, %30 : vector<8x128xf32>
    %c0_24 = arith.constant 0 : index
    %c0_25 = arith.constant 0 : index
    %32 = vector.load %arg10[%c0_24, %c0_25] : memref<8x128xf32, #tpu.memory_space<vmem>>, vector<8x128xf32>
    tpu.vector_store %arg10[%c0_24, %c0_25], %31 {strides = array<i32>} : memref<8x128xf32, #tpu.memory_space<vmem>>, vector<8x128xf32>,
    return
  }
  func.func @transform_0(%arg0: i32) -> (i32, i32) {
    %c0_i32 = arith.constant 0 : i32
    %c0_i32_0 = arith.constant 0 : i32
    return %arg0, %c0_i32 : i32, i32
  }
  func.func @transform_1(%arg0: i32) -> (i32, i32) {
    %c0_i32 = arith.constant 0 : i32
    %c0_i32_0 = arith.constant 0 : i32
    %c0_i32_1 = arith.constant 0 : i32
    return %c0_i32, %c0_i32_0 : i32, i32
  }
  func.func @transform_2(%arg0: i32) -> (i32, i32) {
    %c0_i32 = arith.constant 0 : i32
    %c0_i32_0 = arith.constant 0 : i32
    %c0_i32_1 = arith.constant 0 : i32
    return %c0_i32, %c0_i32_0 : i32, i32
  }
  func.func @transform_3(%arg0: i32) -> (i32, i32) {
    %c0_i32 = arith.constant 0 : i32
    %c0_i32_0 = arith.constant 0 : i32
    %c0_i32_1 = arith.constant 0 : i32
    return %c0_i32, %c0_i32_0 : i32, i32
  }
  func.func @transform_4(%arg0: i32) -> (i32, i32) {
    %c0_i32 = arith.constant 0 : i32
    %c0_i32_0 = arith.constant 0 : i32
    %c0_i32_1 = arith.constant 0 : i32
    return %c0_i32, %c0_i32_0 : i32, i32
  }
  func.func @transform_5(%arg0: i32) -> (i32, i32) {
    %c0_i32 = arith.constant 0 : i32
    %c0_i32_0 = arith.constant 0 : i32
    %c0_i32_1 = arith.constant 0 : i32
    return %c0_i32, %c0_i32_0 : i32, i32
  }
  func.func @transform_6(%arg0: i32) -> (i32, i32) {
    %c0_i32 = arith.constant 0 : i32
    %c0_i32_0 = arith.constant 0 : i32
    %c0_i32_1 = arith.constant 0 : i32
    return %c0_i32, %c0_i32_0 : i32, i32
  }
  func.func @transform_7(%arg0: i32) -> (i32, i32) {
    %c0_i32 = arith.constant 0 : i32
    %c0_i32_0 = arith.constant 0 : i32
    %c0_i32_1 = arith.constant 0 : i32
    return %c0_i32, %c0_i32_0 : i32, i32
  }
  func.func @transform_8(%arg0: i32) -> (i32, i32) {
    %c0_i32 = arith.constant 0 : i32
    %c0_i32_0 = arith.constant 0 : i32
    %c0_i32_1 = arith.constant 0 : i32
    return %c0_i32, %c0_i32_0 : i32, i32
  }
  func.func @transform_9(%arg0: i32) -> (i32, i32) {
    %c0_i32 = arith.constant 0 : i32
    %c0_i32_0 = arith.constant 0 : i32
    return %arg0, %c0_i32 : i32, i32
  }
}

</mosaic_0001>

<bundles_post_ra>
// kernel: tpu_custom_call.1
= control target key start
LH: loop header
LB: loop body
LE: loop exit
PB: predicated region body
PF: predicated region fallthrough
CT: control target
= control target key end

     0   :  { %14 = vsyncpa [#allocation3], 0  ;;  %s1303_s0 = inlined_call_operand.hbm [shape: bf16[64,128], index: 0, kind: input, shape index: {}]   ;;  %s1304_s1 = inlined_call_operand.hbm [shape: bf16[128,128], index: 1, kind: input, shape index: {}]   ;;  %s1305_s2 = inlined_call_operand.vmem [shape: f32[1,128], index: 2, kind: input, shape index: {}]   ;;  %s1306_s3 = inlined_call_operand.hbm [shape: bf16[128,128], index: 3, kind: input, shape index: {}]   ;;  %s1307_s4 = inlined_call_operand.vmem [shape: f32[1,128], index: 4, kind: input, shape index: {}]   ;;  %s1308_s5 = inlined_call_operand.hbm [shape: bf16[128,128], index: 5, kind: input, shape index: {}]   ;;  %s1309_s6 = inlined_call_operand.vmem [shape: f32[1,128], index: 6, kind: input, shape index: {}]   ;;  %s1310_s7 = inlined_call_operand.hbm [shape: bf16[128,128], index: 7, kind: input, shape index: {}]   ;;  %s1311_s8 = inlined_call_operand.vmem [shape: f32[1,128], index: 8, kind: input, shape index: {}]   ;;  %s1312_s9 = inlined_call_operand.hbm [shape: f32[8,128], index: 9, kind: output, shape index: {}]  }
   0x1   :  { %15 = vsyncpa [#allocation6], 0 }
   0x2   :  { %16 = vsyncpa [#allocation9], 0 }
   0x3   :  { %17 = vsyncpa [#allocation4], 0  ;;  %s1112_s30 = smov [#allocation5]   ;;  %s1113_s11 = smov [#allocation8]  }
   0x4   :  { %s35_s10 = sshll.u32 %s1112_s30, 4  ;;  %s63_s12 = sshll.u32 %s1113_s11, 4  ;;  %s36_s10 = int_to_ptr.vmem [resolvable:$true] %s35_s10  ;;  %s1172_s12 = int_to_ptr.vmem [resolvable:$true] %s63_s12 }
   0x5   :  { %s972_s15 = scalar_lea.hbm %s1304_s1, 1024 }
   0x6   :  { %p973_p0 = scmp.ne.s32.totalorder %s1304_s1, %s972_s15  ;;  %p976_p1 = scmp.lt.u32.totalorder %s972_s15, %s1304_s1 }
   0x8   :  { %p978_p2 = pnand %p976_p1, %p973_p0 }
   0xa   :  { %981 = shalt.err (!%p978_p2)
}
   0xb   :  { %s982_s20 = scalar_lea.vmem %s36_s10, 1024  ;;  %p987_p4 = scmp.lt.s32.totalorder %s36_s10, %s36_s10 }
   0xc   :  { %p983_p3 = scmp.ne.s32.totalorder %s36_s10, %s982_s20  ;;  %p988_p5 = scmp.lt.s32.totalorder %s982_s20, %s982_s20 }
   0xe   :  { %p989_p6 = por %p988_p5, %p987_p4 }
  0x10   :  { %p990_p7 = pnand %p989_p6, %p983_p3 }
  0x12   :  { %993 = shalt.err (!%p990_p7)
}
  0x13   :  { %s1114_s21 = smov 64   ;;  %s1115_s22 = smov 4  }
  0x14   :  { %41 = dma.hbm_to_vmem [thread:$0]  %s1304_s1, 1024, %s36_s10, [#allocation6], %s1114_s21, %s1114_s21, %s1115_s22  }
  0x15   :  { %s994_s27 = scalar_lea.hbm %s1308_s5, 1024 }
  0x16   :  { %p995_p8 = scmp.ne.s32.totalorder %s1308_s5, %s994_s27  ;;  %p998_p9 = scmp.lt.u32.totalorder %s994_s27, %s1308_s5 }
  0x18   :  { %p1000_p10 = pnand %p998_p9, %p995_p8 }
  0x1a   :  { %1003 = shalt.err (!%p1000_p10)
}
  0x1b   :  { %s1004_s13 = scalar_lea.vmem %s1172_s12, 1024  ;;  %p1009_p12 = scmp.lt.s32.totalorder %s1172_s12, %s1172_s12 }
  0x1c   :  { %p1005_p11 = scmp.ne.s32.totalorder %s1172_s12, %s1004_s13  ;;  %p1010_p13 = scmp.lt.s32.totalorder %s1004_s13, %s1004_s13 }
  0x1e   :  { %p1011_p0 = por %p1010_p13, %p1009_p12 }
  0x20   :  { %p1012_p1 = pnand %p1011_p0, %p1005_p11 }
  0x22   :  { %1015 = shalt.err (!%p1012_p1)
}
  0x23   :  { %69 = dma.hbm_to_vmem [thread:$0]  %s1308_s5, 1024, %s1172_s12, [#allocation9], %s1114_s21, %s1114_s21, %s1115_s22  }
  0x24   :  { %s1116_s14 = smov [#allocation2]   ;;  %s1117_s16 = smov [#allocation7]  }
  0x25   :  { %s23_s15 = sshll.u32 %s1116_s14, 4  ;;  %s49_s17 = sshll.u32 %s1117_s16, 4  ;;  %s24_s15 = int_to_ptr.vmem [resolvable:$true] %s23_s15  ;;  %s1209_s17 = int_to_ptr.vmem [resolvable:$true] %s49_s17 }
  0x26   :  { %s1016_s20 = scalar_lea.hbm %s1303_s0, 512 }
  0x27   :  { %p1017_p2 = scmp.ne.s32.totalorder %s1303_s0, %s1016_s20  ;;  %p1020_p3 = scmp.lt.u32.totalorder %s1016_s20, %s1303_s0 }
  0x29   :  { %p1022_p4 = pnand %p1020_p3, %p1017_p2 }
  0x2b   :  { %1025 = shalt.err (!%p1022_p4)
}
  0x2c   :  { %s1026_s5 = scalar_lea.vmem %s24_s15, 512  ;;  %p1031_p6 = scmp.lt.s32.totalorder %s24_s15, %s24_s15 }
  0x2d   :  { %p1027_p5 = scmp.ne.s32.totalorder %s24_s15, %s1026_s5  ;;  %p1032_p7 = scmp.lt.s32.totalorder %s1026_s5, %s1026_s5 }
  0x2f   :  { %p1033_p8 = por %p1032_p7, %p1031_p6 }
  0x31   :  { %p1034_p9 = pnand %p1033_p8, %p1027_p5 }
  0x33   :  { %1037 = shalt.err (!%p1034_p9)
}
  0x34   :  { %29 = dma.hbm_to_vmem [thread:$0]  %s1303_s0, 512, %s24_s15, [#allocation3], %s1114_s21, %s1114_s21, %s1115_s22  }
  0x35   :  { %s1038_s30 = scalar_lea.hbm %s1306_s3, 1024 }
  0x36   :  { %p1039_p10 = scmp.ne.s32.totalorder %s1306_s3, %s1038_s30  ;;  %p1042_p11 = scmp.lt.u32.totalorder %s1038_s30, %s1306_s3 }
  0x38   :  { %p1044_p12 = pnand %p1042_p11, %p1039_p10 }
  0x3a   :  { %1047 = shalt.err (!%p1044_p12)
}
  0x3b   :  { %s1048_s14 = scalar_lea.vmem %s1209_s17, 1024  ;;  %p1053_p0 = scmp.lt.s32.totalorder %s1209_s17, %s1209_s17 }
  0x3c   :  { %p1049_p13 = scmp.ne.s32.totalorder %s1209_s17, %s1048_s14  ;;  %p1054_p1 = scmp.lt.s32.totalorder %s1048_s14, %s1048_s14 }
  0x3e   :  { %p1055_p2 = por %p1054_p1, %p1053_p0 }
  0x40   :  { %p1056_p3 = pnand %p1055_p2, %p1049_p13 }
  0x42   :  { %1059 = shalt.err (!%p1056_p3)
}
  0x43   :  { %55 = dma.hbm_to_vmem [thread:$0]  %s1306_s3, 1024, %s1209_s17, [#allocation6], %s1114_s21, %s1114_s21, %s1115_s22  }
  0x44   :  { %s1118_s16 = smov [#allocation10]   ;;  %s1060_s23 = scalar_lea.hbm %s1310_s7, 1024 }
  0x45   :  { %s77_s18 = sshll.u32 %s1118_s16, 4  ;;  %p1061_p4 = scmp.ne.s32.totalorder %s1310_s7, %s1060_s23  ;;  %s78_s18 = int_to_ptr.vmem [resolvable:$true] %s77_s18 }
  0x46   :  { %p1064_p5 = scmp.lt.u32.totalorder %s1060_s23, %s1310_s7 }
  0x48   :  { %p1066_p6 = pnand %p1064_p5, %p1061_p4 }
  0x4a   :  { %1069 = shalt.err (!%p1066_p6)
}
  0x4b   :  { %s1070_s12 = scalar_lea.vmem %s78_s18, 1024  ;;  %p1075_p8 = scmp.lt.s32.totalorder %s78_s18, %s78_s18 }
  0x4c   :  { %p1071_p7 = scmp.ne.s32.totalorder %s78_s18, %s1070_s12  ;;  %p1076_p9 = scmp.lt.s32.totalorder %s1070_s12, %s1070_s12 }
  0x4e   :  { %p1077_p10 = por %p1076_p9, %p1075_p8 }
  0x50   :  { %p1078_p11 = pnand %p1077_p10, %p1071_p7 }
  0x52   :  { %1081 = shalt.err (!%p1078_p11)
}
  0x53   :  { %83 = dma.hbm_to_vmem [thread:$0]  %s1310_s7, 1024, %s78_s18, [#allocation9], %s1114_s21, %s1114_s21, %s1115_s22  }
  0x54   :  { %1104 = dma.done.wait [#allocation3], 512  }
  0x55   :  { %1105 = vsyncadd [#allocation3], 4294966784 }
  0x56   :  { %1106 = dma.done.wait [#allocation6], 2048  }
  0x57   :  { %1107 = vsyncadd [#allocation6], 4294965248 }
  0x58   :  { %1108 = dma.done.wait [#allocation9], 2048  }
  0x59   :  { %1109 = vsyncadd [#allocation9], 4294965248  ;;  %v936_v0 = vld [vmem:[#allocation5] sm:$0xff]   ;;  %v937_v1 = vld [vmem:[#allocation5 + $0x8] sm:$0xff]   ;;  %v1119_v50 = vmov 0.0   ;;  %vm1120_vm0 = vmmov 0  }
  0x5a   :  { %838 = vmatprep.subr.bf16.mxu0 %v936_v0  ;;  %v938_v2 = vld [vmem:[#allocation5 + $0x10] sm:$0xff]   ;;  %v939_v3 = vld [vmem:[#allocation5 + $0x18] sm:$0xff]   ;;  %v944_v4 = vld [vmem:[#allocation2] sm:$0xff]   ;;  %vm521_vm1 = vcmask 1041409   ;;  %vm523_vm2 = vcmask 1042434   ;;  %vm525_vm3 = vcmask 1043459  }
  0x5b   :  { %839 = vmatpush3.bf16.msra.mxu0 %v936_v0  ;;  %854 = vmatprep.mubr.bf16.mxu0 %v944_v4  ;;  %v940_v5 = vld [vmem:[#allocation5 + $0x20] sm:$0xff]   ;;  %v949_v7 = vld [vmem:[#allocation7 + $0x8] sm:$0xff]   ;;  %v950_v9 = vld [vmem:[#allocation7 + $0x10] sm:$0xff]   ;;  %vm527_vm4 = vcmask 1044484   ;;  %vm529_vm5 = vcmask 1045509   ;;  %vm531_vm6 = vcmask 1046534  }
  0x5c   :  { %840 = vmatprep.subr.bf16.mxu0 %v937_v1  ;;  %v948_v6 = vld [vmem:[#allocation7] sm:$0xff]   ;;  %v941_v8 = vld [vmem:[#allocation5 + $0x28] sm:$0xff]   ;;  %v942_v10 = vld [vmem:[#allocation5 + $0x30] sm:$0xff]   ;;  %vm533_vm7 = vcmask 1047559   ;;  %s1121_s30 = smov [#allocation11]  }
  0x5d   :  { %862 = vmatprep.subr.bf16.mxu1 %v948_v6  ;;  %v951_v11 = vld [vmem:[#allocation7 + $0x18] sm:$0xff]   ;;  %v952_v13 = vld [vmem:[#allocation7 + $0x20] sm:$0xff]   ;;  %v953_v14 = vld [vmem:[#allocation7 + $0x28] sm:$0xff]   ;;  %s745_s11 = sshll.u32 %s1121_s30, 4  ;;  %s746_s11 = int_to_ptr.vmem [resolvable:$true] %s745_s11 }
  0x5e   :  { %863 = vmatpush3.bf16.msra.mxu1 %v948_v6  ;;  %v943_v12 = vld [vmem:[#allocation5 + $0x38] sm:$0xff]   ;;  %v945_v15 = vld [vmem:[#allocation2 + $0x8] sm:$0xff]   ;;  %v946_v16 = vld [vmem:[#allocation2 + $0x10] sm:$0xff]   ;;  %p1087_p13 = scmp.lt.s32.totalorder %s746_s11, %s746_s11 }
  0x5f   :  { %841 = vmatpush3.bf16.msra.mxu0 %v937_v1  ;;  %864 = vmatprep.subr.bf16.mxu1 %v949_v7  ;;  %v947_v17 = vld [vmem:[#allocation2 + $0x18] sm:$0xff]   ;;  %v954_v18 = vld [vmem:[#allocation7 + $0x30] sm:$0xff]   ;;  %v756_v20 = vld [vmem:[%s1305_s2] ss:$0 sm:$0xff] }
  0x60   :  { %842 = vmatprep.subr.bf16.mxu0 %v938_v2  ;;  %v955_v19 = vld [vmem:[#allocation7 + $0x38] sm:$0xff]   ;;  %v956_v49 = vld [vmem:[#allocation8] sm:$0xff]   ;;  %v957_v51 = vld [vmem:[#allocation8 + $0x8] sm:$0xff]  }
  0x61   :  { %v958_v52 = vld [vmem:[#allocation8 + $0x10] sm:$0xff]   ;;  %v959_v53 = vld [vmem:[#allocation8 + $0x18] sm:$0xff]   ;;  %v960_v54 = vld [vmem:[#allocation8 + $0x20] sm:$0xff]  }
  0x62   :  { %865 = vmatpush3.bf16.msra.mxu1 %v949_v7  ;;  %v961_v55 = vld [vmem:[#allocation8 + $0x28] sm:$0xff]   ;;  %v962_v56 = vld [vmem:[#allocation8 + $0x30] sm:$0xff]   ;;  %v963_v57 = vld [vmem:[#allocation8 + $0x38] sm:$0xff]  }
  0x63   :  { %843 = vmatpush3.bf16.msra.mxu0 %v938_v2  ;;  %866 = vmatprep.subr.bf16.mxu1 %v950_v9  ;;  %v964_v58 = vld [vmem:[#allocation10] sm:$0xff]   ;;  %v965_v59 = vld [vmem:[#allocation10 + $0x8] sm:$0xff]   ;;  %v966_v60 = vld [vmem:[#allocation10 + $0x10] sm:$0xff]  }
  0x64   :  { %844 = vmatprep.subr.bf16.mxu0 %v939_v3  ;;  %v967_v61 = vld [vmem:[#allocation10 + $0x18] sm:$0xff]   ;;  %v968_v62 = vld [vmem:[#allocation10 + $0x20] sm:$0xff]   ;;  %v969_v63 = vld [vmem:[#allocation10 + $0x28] sm:$0xff]  }
  0x65   :  { %v769_v0 = vld [vmem:[%s1307_s4] ss:$0 sm:$0xff] }
  0x66   :  { %867 = vmatpush3.bf16.msra.mxu1 %v950_v9 }
  0x67   :  { %845 = vmatpush3.bf16.msra.mxu0 %v939_v3  ;;  %868 = vmatprep.subr.bf16.mxu1 %v951_v11 }
  0x68   :  { %846 = vmatprep.subr.bf16.mxu0 %v940_v5 }
  0x6a   :  { %869 = vmatpush3.bf16.msra.mxu1 %v951_v11 }
  0x6b   :  { %847 = vmatpush3.bf16.msra.mxu0 %v940_v5  ;;  %870 = vmatprep.subr.bf16.mxu1 %v952_v13 }
  0x6c   :  { %848 = vmatprep.subr.bf16.mxu0 %v941_v8 }
  0x6e   :  { %871 = vmatpush3.bf16.msra.mxu1 %v952_v13 }
  0x6f   :  { %849 = vmatpush3.bf16.msra.mxu0 %v941_v8  ;;  %872 = vmatprep.subr.bf16.mxu1 %v953_v14 }
  0x70   :  { %850 = vmatprep.subr.bf16.mxu0 %v942_v10 }
  0x72   :  { %873 = vmatpush3.bf16.msra.mxu1 %v953_v14 }
  0x73   :  { %851 = vmatpush3.bf16.msra.mxu0 %v942_v10  ;;  %874 = vmatprep.subr.bf16.mxu1 %v954_v18 }
  0x74   :  { %852 = vmatprep.subr.bf16.mxu0 %v943_v12 }
  0x76   :  { %875 = vmatpush3.bf16.msra.mxu1 %v954_v18 }
  0x77   :  { %853 = vmatpush3.bf16.msra.mxu0 %v943_v12  ;;  %876 = vmatprep.subr.bf16.mxu1 %v955_v19 }
  0x78   :  { %886 = vmatprep.subr.bf16.mxu0 %v1119_v50 }
  0x7a   :  { %855 = vmatmul.mubr.bf16.vlgmr.msra.gmra.mrb[0].mxu0 %v945_v15  ;;  %877 = vmatpush3.bf16.msra.mxu1 %v955_v19 }
  0x7b   :  { %858 = vmatprep.mubr.bf16.mxu0 %v946_v16  ;;  %906 = vmatprep.subr.bf16.mxu1 %v1119_v50 }
  0x7c   :  { %887 = vmatpush3.bf16.msra.mxu0 %v956_v49 }
  0x7d   :  { %888 = vmatprep.subr.bf16.mxu0 %v1119_v50 }
  0x80   :  { %889 = vmatpush3.bf16.msra.mxu0 %v957_v51 }
  0x81   :  { %890 = vmatprep.subr.bf16.mxu0 %v1119_v50 }
  0x82   :  { %859 = vmatmul.mubr.bf16.gmra.mrb[4].mxu0 %v947_v17 }
  0x83   :  { %902 = vmatprep.mubr.msk.bf16.mxu0 %vm1120_vm0, %v1119_v50 }
  0x84   :  { %891 = vmatpush3.bf16.msra.mxu0 %v958_v52 }
  0x85   :  { %892 = vmatprep.subr.bf16.mxu0 %v1119_v50 }
  0x88   :  { %893 = vmatpush3.bf16.msra.mxu0 %v959_v53 }
  0x89   :  { %894 = vmatprep.subr.bf16.mxu0 %v1119_v50 }
  0x8c   :  { %895 = vmatpush3.bf16.msra.mxu0 %v960_v54 }
  0x8d   :  { %896 = vmatprep.subr.bf16.mxu0 %v1119_v50 }
  0x90   :  { %897 = vmatpush3.bf16.msra.mxu0 %v961_v55 }
  0x91   :  { %898 = vmatprep.subr.bf16.mxu0 %v1119_v50 }
  0x94   :  { %899 = vmatpush3.bf16.msra.mxu0 %v962_v56 }
  0x95   :  { %900 = vmatprep.subr.bf16.mxu0 %v1119_v50 }
  0x98   :  { %901 = vmatpush3.bf16.msra.mxu0 %v963_v57 }
 0x14d   :  { %v856_v21 = vpop.f32.mrb[0].mxu0 }
 0x14e   :  { %v248_v22 = vadd.f32 %v856_v21, %v756_v20  ;;  %v239_v23 = vpop.f32.mrb[1].mxu0 }
 0x14f   :  { %v240_v24 = vadd.f32 %v756_v20, %v239_v23  ;;  %v857_v25 = vpop.f32.mrb[2].mxu0 }
 0x150   :  { %v251_v26 = vadd.f32 %v857_v25, %v756_v20  ;;  %v242_v27 = vpop.f32.mrb[3].mxu0  ;;  %v272_v29 = vmax.f32 %v248_v22, 0.0 }
 0x151   :  { %v243_v28 = vadd.f32 %v756_v20, %v242_v27  ;;  %v270_v31 = vmax.f32 %v240_v24, 0.0 }
 0x152   :  { %v273_v30 = vmax.f32 %v251_v26, 0.0 }
 0x153   :  { %v271_v32 = vmax.f32 %v243_v28, 0.0 }
 0x154   :  { %v279_v33 = vpack.c.bf16 %v273_v30, %v272_v29 }
 0x155   :  { %v860_v34 = vpop.f32.mrb[4].mxu0  ;;  %v278_v35 = vpack.c.bf16 %v271_v32, %v270_v31 }
 0x156   :  { %v264_v36 = vadd.f32 %v860_v34, %v756_v20  ;;  %v255_v37 = vpop.f32.mrb[5].mxu0 }
 0x157   :  { %v256_v38 = vadd.f32 %v756_v20, %v255_v37  ;;  %v861_v39 = vpop.f32.mrb[6].mxu0  ;;  %878 = vmatprep.mubr.bf16.mxu1 %v278_v35 }
 0x158   :  { %v267_v40 = vadd.f32 %v861_v39, %v756_v20  ;;  %v258_v41 = vpop.f32.mrb[7].mxu0  ;;  %879 = vmatmul.mubr.bf16.vlgmr.msra.gmra.mrb[0].mxu1 %v279_v33  ;;  %v276_v43 = vmax.f32 %v264_v36, 0.0 }
 0x159   :  { %v259_v42 = vadd.f32 %v756_v20, %v258_v41  ;;  %v274_v45 = vmax.f32 %v256_v38, 0.0  ;;  %907 = vmatpush3.bf16.msra.mxu1 %v964_v58 }
 0x15a   :  { %v277_v44 = vmax.f32 %v267_v40, 0.0  ;;  %908 = vmatprep.subr.bf16.mxu1 %v1119_v50 }
 0x15b   :  { %v275_v46 = vmax.f32 %v259_v42, 0.0 }
 0x15c   :  { %v281_v47 = vpack.c.bf16 %v277_v44, %v276_v43 }
 0x15d   :  { %v280_v48 = vpack.c.bf16 %v275_v46, %v274_v45  ;;  %909 = vmatpush3.bf16.msra.mxu1 %v965_v59 }
 0x15e   :  { %910 = vmatprep.subr.bf16.mxu1 %v1119_v50 }
 0x15f   :  { %882 = vmatprep.mubr.bf16.mxu1 %v280_v48 }
 0x160   :  { %883 = vmatmul.mubr.bf16.gmra.mrb[4].mxu1 %v281_v47 }
 0x161   :  { %922 = vmatprep.mubr.msk.bf16.mxu1 %vm1120_vm0, %v1119_v50  ;;  %911 = vmatpush3.bf16.msra.mxu1 %v966_v60 }
 0x162   :  { %912 = vmatprep.subr.bf16.mxu1 %v1119_v50 }
 0x165   :  { %913 = vmatpush3.bf16.msra.mxu1 %v967_v61 }
 0x166   :  { %914 = vmatprep.subr.bf16.mxu1 %v1119_v50 }
 0x169   :  { %915 = vmatpush3.bf16.msra.mxu1 %v968_v62 }
 0x16a   :  { %916 = vmatprep.subr.bf16.mxu1 %v1119_v50 }
 0x16d   :  { %917 = vmatpush3.bf16.msra.mxu1 %v969_v63 }
 0x16e   :  { %918 = vmatprep.subr.bf16.mxu1 %v1119_v50 }
 0x22b   :  { %v880_v1 = vpop.f32.mrb[0].mxu1 }
 0x22c   :  { %v396_v2 = vadd.f32 %v880_v1, %v769_v0  ;;  %v387_v3 = vpop.f32.mrb[1].mxu1 }
 0x22d   :  { %v388_v4 = vadd.f32 %v769_v0, %v387_v3  ;;  %v881_v5 = vpop.f32.mrb[2].mxu1 }
 0x22e   :  { %v420_v6 = vmax.f32 %v396_v2, 0.0  ;;  %v399_v7 = vadd.f32 %v881_v5, %v769_v0  ;;  %v390_v8 = vpop.f32.mrb[3].mxu1 }
 0x22f   :  { %v418_v9 = vmax.f32 %v388_v4, 0.0  ;;  %v391_v10 = vadd.f32 %v769_v0, %v390_v8 }
 0x230   :  { %v438_v11 = vrot.slane %v420_v6, 4  ;;  %v421_v12 = vmax.f32 %v399_v7, 0.0 }
 0x231   :  { %v426_v13 = vrot.slane %v418_v9, 4  ;;  %v419_v14 = vmax.f32 %v391_v10, 0.0 }
 0x232   :  { %v439_v15 = vadd.f32 %v438_v11, %v420_v6  ;;  %v444_v16 = vrot.slane %v421_v12, 4 }
 0x233   :  { %v427_v17 = vadd.f32 %v426_v13, %v418_v9  ;;  %v432_v18 = vrot.slane %v419_v14, 4  ;;  %v884_v19 = vpop.f32.mrb[4].mxu1 }
 0x234   :  { %v440_v20 = vrot.slane %v439_v15, 2  ;;  %v445_v21 = vadd.f32 %v444_v16, %v421_v12  ;;  %v412_v22 = vadd.f32 %v884_v19, %v769_v0  ;;  %v403_v23 = vpop.f32.mrb[5].mxu1 }
 0x235   :  { %v428_v24 = vrot.slane %v427_v17, 2  ;;  %v433_v25 = vadd.f32 %v432_v18, %v419_v14  ;;  %v404_v26 = vadd.f32 %v769_v0, %v403_v23  ;;  %v885_v27 = vpop.f32.mrb[6].mxu1 }
 0x236   :  { %v441_v28 = vadd.f32 %v440_v20, %v439_v15  ;;  %v446_v29 = vrot.slane %v445_v21, 2  ;;  %v424_v30 = vmax.f32 %v412_v22, 0.0  ;;  %v415_v31 = vadd.f32 %v885_v27, %v769_v0  ;;  %v406_v32 = vpop.f32.mrb[7].mxu1 }
 0x237   :  { %v429_v33 = vadd.f32 %v428_v24, %v427_v17  ;;  %v434_v34 = vrot.slane %v433_v25, 2  ;;  %v422_v35 = vmax.f32 %v404_v26, 0.0  ;;  %v407_v36 = vadd.f32 %v769_v0, %v406_v32 }
 0x238   :  { %v442_v37 = vrot.slane %v441_v28, 1  ;;  %v447_v38 = vadd.f32 %v446_v29, %v445_v21  ;;  %v462_v39 = vrot.slane %v424_v30, 4  ;;  %v425_v40 = vmax.f32 %v415_v31, 0.0 }
 0x239   :  { %v430_v41 = vrot.slane %v429_v33, 1  ;;  %v435_v42 = vadd.f32 %v434_v34, %v433_v25  ;;  %v450_v43 = vrot.slane %v422_v35, 4  ;;  %v423_v44 = vmax.f32 %v407_v36, 0.0  ;;  %v970_v34 = vld [vmem:[#allocation10 + $0x30] sm:$0xff]   ;;  %v778_v36 = vld [vmem:[%s1309_s6] ss:$0 sm:$0xff] }
 0x23a   :  { %v443_v45 = vadd.f32 %v442_v37, %v441_v28  ;;  %v448_v46 = vrot.slane %v447_v38, 1  ;;  %v463_v47 = vadd.f32 %v462_v39, %v424_v30  ;;  %v468_v48 = vrot.slane %v425_v40, 4  ;;  %919 = vmatpush3.bf16.msra.mxu1 %v970_v34  ;;  %s1082_s6 = scalar_lea.vmem %s746_s11, 128 }
 0x23b   :  { %v431_v49 = vadd.f32 %v430_v41, %v429_v33  ;;  %v436_v51 = vrot.slane %v435_v42, 1  ;;  %v451_v52 = vadd.f32 %v450_v43, %v422_v35  ;;  %v456_v53 = vrot.slane %v423_v44, 4  ;;  %920 = vmatprep.subr.bf16.mxu1 %v1119_v50  ;;  %v971_v35 = vld [vmem:[#allocation10 + $0x38] sm:$0xff]   ;;  %p1083_p12 = scmp.ne.s32.totalorder %s746_s11, %s1082_s6  ;;  %p1088_p0 = scmp.lt.s32.totalorder %s1082_s6, %s1082_s6 }
 0x23c   :  { %v449_v54 = vadd.f32 %v448_v46, %v447_v38  ;;  %v464_v55 = vrot.slane %v463_v47, 2  ;;  %v469_v56 = vadd.f32 %v468_v48, %v425_v40  ;;  %v476_v61 = vpack.c.bf16 %v443_v45, %v443_v45 }
 0x23d   :  { %v474_v57 = vpack.c.bf16 %v431_v49, %v431_v49  ;;  %v437_v58 = vadd.f32 %v436_v51, %v435_v42  ;;  %v452_v59 = vrot.slane %v451_v52, 2  ;;  %v457_v60 = vadd.f32 %v456_v53, %v423_v44  ;;  %v787_v44 = vld [vmem:[%s1311_s8] ss:$0 sm:$0xff]  ;;  %p1089_p1 = por %p1088_p0, %p1087_p13 }
 0x23e   :  { %v465_v62 = vadd.f32 %v464_v55, %v463_v47  ;;  %v470_v63 = vrot.slane %v469_v56, 2  ;;  %v477_v0 = vpack.c.bf16 %v449_v54, %v449_v54  ;;  %v515_v10 = vunpack.c.l.b16 %v476_v61  ;;  %921 = vmatpush3.bf16.msra.mxu1 %v971_v35 }
 0x23f   :  { %v475_v1 = vpack.c.bf16 %v437_v58, %v437_v58  ;;  %v453_v2 = vadd.f32 %v452_v59, %v451_v52  ;;  %v458_v3 = vrot.slane %v457_v60, 2  ;;  %v513_v6 = vunpack.c.l.b16 %v474_v57  ;;  %p1090_p2 = pnand %p1089_p1, %p1083_p12 }
 0x240   :  { %v466_v4 = vrot.slane %v465_v62, 1  ;;  %v471_v5 = vadd.f32 %v470_v63, %v469_v56  ;;  %v516_v13 = vunpack.c.l.b16 %v477_v0 }
 0x241   :  { %v514_v7 = vunpack.c.l.b16 %v475_v1  ;;  %v454_v8 = vrot.slane %v453_v2, 1  ;;  %v459_v9 = vadd.f32 %v458_v3, %v457_v60 }
 0x242   :  { %v467_v11 = vadd.f32 %v466_v4, %v465_v62  ;;  %v472_v12 = vrot.slane %v471_v5, 1 }
 0x243   :  { %v522_v14 = vsel %vm521_vm1, %v514_v7, %v513_v6  ;;  %v455_v15 = vadd.f32 %v454_v8, %v453_v2  ;;  %v460_v16 = vrot.slane %v459_v9, 1 }
 0x244   :  { %v524_v17 = vsel %vm523_vm2, %v515_v10, %v522_v14  ;;  %v473_v18 = vadd.f32 %v472_v12, %v471_v5  ;;  %v480_v22 = vpack.c.bf16 %v467_v11, %v467_v11 }
 0x245   :  { %v478_v19 = vpack.c.bf16 %v455_v15, %v455_v15  ;;  %v526_v20 = vsel %vm525_vm3, %v516_v13, %v524_v17  ;;  %v461_v21 = vadd.f32 %v460_v16, %v459_v9 }
 0x246   :  { %v481_v24 = vpack.c.bf16 %v473_v18, %v473_v18  ;;  %v519_v28 = vunpack.c.l.b16 %v480_v22 }
 0x247   :  { %v517_v23 = vunpack.c.l.b16 %v478_v19  ;;  %v479_v25 = vpack.c.bf16 %v461_v21, %v461_v21 }
 0x248   :  { %v520_v29 = vunpack.c.l.b16 %v481_v24 }
 0x249   :  { %v528_v26 = vsel %vm527_vm4, %v517_v23, %v526_v20  ;;  %v518_v27 = vunpack.c.l.b16 %v479_v25 }
 0x24b   :  { %v530_v30 = vsel %vm529_vm5, %v518_v27, %v528_v26 }
 0x24c   :  { %v532_v31 = vsel %vm531_vm6, %v519_v28, %v530_v30 }
 0x24d   :  { %v534_v32 = vsel %vm533_vm7, %v520_v29, %v532_v31 }
 0x24e   :  { %v535_v33 = vpack.c.b16 %v534_v32, %v534_v32 }
 0x250   :  { %903 = vmatmul.mubr.bf16.vlgmr.msra.gmra.mrb[8].mxu0 %v535_v33 }
 0x323   :  { %v619_v37 = vpop.f32.mrb[8].mxu0 }
 0x324   :  { %v620_v38 = vadd.f32 %v778_v36, %v619_v37  ;;  %v904_v39 = vpop.f32.mrb[9].mxu0 }
 0x325   :  { %v622_v40 = vpop.f32.mrb[10].mxu0 }
 0x326   :  { %v625_v41 = vmax.f32 %v620_v38, 0.0  ;;  %v905_v42 = vpop.f32.mrb[11].mxu0 }
 0x328   :  { %v626_v43 = vpack.c.bf16 %v625_v41, %v625_v41 }
 0x32a   :  { %923 = vmatmul.mubr.bf16.vlgmr.msra.gmra.mrb[8].mxu1 %v626_v43 }
 0x3fd   :  { %v732_v50 = vpop.f32.mrb[8].mxu1 }
 0x3fe   :  { %v733_v45 = vadd.f32 %v787_v44, %v732_v50  ;;  %v924_v46 = vpop.f32.mrb[9].mxu1 }
 0x3ff   :  { %v735_v47 = vpop.f32.mrb[10].mxu1 }
 0x400   :  { %738 = vst [vmem:[#allocation11] sm:$0xff] %v733_v45  ;;  %v925_v48 = vpop.f32.mrb[11].mxu1 }
 0x401   :  { %1093 = shalt.err (!%p1090_p2)
}
 0x402   :  { %s1094_s8 = scalar_lea.hbm %s1312_s9, 128 }
 0x403   :  { %p1095_p3 = scmp.ne.s32.totalorder %s1312_s9, %s1094_s8  ;;  %p1098_p4 = scmp.lt.u32.totalorder %s1094_s8, %s1312_s9 }
 0x405   :  { %p1100_p5 = pnand %p1098_p4, %p1095_p3 }
 0x407   :  { %1103 = shalt.err (!%p1100_p5)
}
 0x408   :  { %748 = dma.vmem_to_hbm [thread:$0]  %s746_s11, 128, %s1312_s9, [#allocation4]  }
 0x409   :  { %1110 = dma.done.wait [#allocation4], 128  }
 0x40a   :  { %1111 = vsyncadd [#allocation4], 4294967168 }
 0x40b   :  { %752 = vsyncpa [#allocation3], 1 }
 0x40c   :  { %753 = vsyncpa [#allocation6], 1 }
 0x40d   :  { %754 = vsyncpa [#allocation9], 1 }
 0x40e   :  { %755 = vsyncpa [#allocation4], 1 }

</bundles_post_ra>
